<compile_context>
chip_gen: v7x
topology: tpu7x:2x2x1
jax: 0.10.0
libtpu: 0.0.40
codegen_flags: <defaults>
</compile_context>

<pallas_src>
import functools

import jax
import jax.numpy as jnp
from jax.experimental import pallas as pl
from jax.experimental.pallas import tpu as pltpu


def _round_up(n: int, m: int) -> int:
    return ((n + m - 1) // m) * m


def mlp_actor_kernel(x_ref, w1_ref, b1_ref, w2_ref, b2_ref, o_ref):
    # Everything is already f32 and VMEM-resident; the two matmuls hit the MXU
    # with f32 accumulation, ReLU/bias-add run on the VPU.
    x = x_ref[...]
    h = jnp.dot(x, w1_ref[...], preferred_element_type=jnp.float32) + b1_ref[...]
    h = jnp.maximum(h, 0.0)
    o_ref[...] = (
        jnp.dot(h, w2_ref[...], preferred_element_type=jnp.float32) + b2_ref[...]
    )


@functools.partial(jax.jit, static_argnames=("block_batch",))
def mlp_actor_forward(x, w1_t, b1, w2_t, b2, *, block_batch: int = 512):
    """x: (B, obs); w1_t: (obs, hidden); b1: (hidden,); w2_t: (hidden, n_actions); b2: (n_actions,)."""
    B, obs = x.shape
    hidden = w1_t.shape[1]
    n_actions = w2_t.shape[1]

    # --- Lane-dense padding of the N dims (hidden, n_actions) to 128 multiples.
    Hp = _round_up(hidden, 128)
    Ap = _round_up(n_actions, 128)
    w1p = jnp.zeros((obs, Hp), jnp.float32).at[:, :hidden].set(w1_t.astype(jnp.float32))
    b1p = jnp.zeros((1, Hp), jnp.float32).at[:, :hidden].set(
        b1.reshape(1, -1).astype(jnp.float32)
    )
    w2p = jnp.zeros((Hp, Ap), jnp.float32).at[:hidden, :n_actions].set(
        w2_t.astype(jnp.float32)
    )
    b2p = jnp.zeros((1, Ap), jnp.float32).at[:, :n_actions].set(
        b2.reshape(1, -1).astype(jnp.float32)
    )

    # --- Batch tiling: TB multiple of 8, capped at block_batch; pad B up to a
    #     multiple of TB so every grid step sees a full (TB, obs) x-tile.
    TB = min(block_batch, _round_up(B, 8))
    Bp = _round_up(B, TB)
    xf = x.astype(jnp.float32)  # mirrors torch's x.float()
    if Bp != B:
        xf = jnp.pad(xf, ((0, Bp - B), (0, 0)))

    grid = (Bp // TB,)
    out = pl.pallas_call(
        mlp_actor_kernel,
        out_shape=jax.ShapeDtypeStruct((Bp, Ap), jnp.float32),
        grid=grid,
        in_specs=[
            # x: tiled along batch (pipelined / double-buffered by Pallas).
            pl.BlockSpec((TB, obs), lambda i: (i, 0)),
            # Weights & biases: constant index map -> VMEM-resident across grid.
            pl.BlockSpec((obs, Hp), lambda i: (0, 0)),
            pl.BlockSpec((1, Hp), lambda i: (0, 0)),
            pl.BlockSpec((Hp, Ap), lambda i: (0, 0)),
            pl.BlockSpec((1, Ap), lambda i: (0, 0)),
        ],
        out_specs=pl.BlockSpec((TB, Ap), lambda i: (i, 0)),
        compiler_params=pltpu.CompilerParams(
            # Batch tiles are independent -> shard across TensorCores (v7x).
            dimension_semantics=("parallel",),
        ),
    )(xf, w1p, b1p, w2p, b2p)

    # Strip batch and lane padding.
    return out[:B, :n_actions]


def init_params(key, obs_size, n_actions, hidden_size=32):
    """Deterministic init mimicking nn.Linear's uniform(-1/sqrt(fan_in), 1/sqrt(fan_in))."""
    k1, k2, k3, k4 = jax.random.split(key, 4)
    bound1 = 1.0 / jnp.sqrt(jnp.float32(obs_size))
    bound2 = 1.0 / jnp.sqrt(jnp.float32(hidden_size))
    # torch weight shape is (out, in); we store the transpose (in, out) for the kernel.
    w1_t = jax.random.uniform(k1, (obs_size, hidden_size), jnp.float32, -bound1, bound1)
    b1 = jax.random.uniform(k2, (hidden_size,), jnp.float32, -bound1, bound1)
    w2_t = jax.random.uniform(k3, (hidden_size, n_actions), jnp.float32, -bound2, bound2)
    b2 = jax.random.uniform(k4, (n_actions,), jnp.float32, -bound2, bound2)
    return w1_t, b1, w2_t, b2


def _reference(x, w1_t, b1, w2_t, b2):
    h = jnp.maximum(x.astype(jnp.float32) @ w1_t + b1[None, :], 0.0)
    return h @ w2_t + b2[None, :]


if __name__ == "__main__":
    obs_size, n_actions, hidden_size = 16, 4, 32

    key = jax.random.PRNGKey(0)
    kx1, kx2, kp = jax.random.split(key, 3)
    w1_t, b1, w2_t, b2 = init_params(kp, obs_size, n_actions, hidden_size)

    # Small batch (single-tile path).
    x_small = jax.random.normal(kx1, (8, obs_size), jnp.float32)
    out_small = jax.block_until_ready(mlp_actor_forward(x_small, w1_t, b1, w2_t, b2))
    ref_small = _reference(x_small, w1_t, b1, w2_t, b2)
    assert out_small.shape == (8, n_actions)
    assert jnp.allclose(out_small, ref_small, atol=1e-4, rtol=1e-4)

    # Larger, non-multiple batch (exercises the batch grid + padding path).
    x_big = jax.random.normal(kx2, (1030, obs_size), jnp.float32)
    out_big = jax.block_until_ready(mlp_actor_forward(x_big, w1_t, b1, w2_t, b2))
    ref_big = _reference(x_big, w1_t, b1, w2_t, b2)
    assert out_big.shape == (1030, n_actions)
    assert jnp.allclose(out_big, ref_big, atol=1e-4, rtol=1e-4)

    print("KERNEL_OK")
</pallas_src>

<mosaic_0001>
module attributes {stable_mosaic.version = 11 : i64} {
  func.func @mlp_actor_kernel(%arg0: i32, %arg1: memref<8x16xf32, #tpu.memory_space<vmem>>, %arg2: memref<16x128xf32, #tpu.memory_space<vmem>>, %arg3: memref<1x128xf32, #tpu.memory_space<vmem>>, %arg4: memref<128x128xf32, #tpu.memory_space<vmem>>, %arg5: memref<1x128xf32, #tpu.memory_space<vmem>>, %arg6: memref<8x128xf32, #tpu.memory_space<vmem>>) attributes {dimension_semantics = [#tpu.dimension_semantics<parallel>], iteration_bounds = array<i64: 1>, scalar_prefetch = 0 : i64, scratch_operands = 0 : i64, tpu.core_type = #tpu.core_type<tc>, window_params = [{transform_indices = @transform_0, window_bounds = array<i64: 8, 16>}, {pipeline_mode = #tpu.pipeline_mode<synchronous>, transform_indices = @transform_1, window_bounds = array<i64: 16, 128>}, {pipeline_mode = #tpu.pipeline_mode<synchronous>, transform_indices = @transform_2, window_bounds = array<i64: 1, 128>}, {pipeline_mode = #tpu.pipeline_mode<synchronous>, transform_indices = @transform_3, window_bounds = array<i64: 128, 128>}, {pipeline_mode = #tpu.pipeline_mode<synchronous>, transform_indices = @transform_4, window_bounds = array<i64: 1, 128>}, {transform_indices = @transform_5, window_bounds = array<i64: 8, 128>}]} {
    %c0 = arith.constant 0 : index
    %c0_0 = arith.constant 0 : index
    %0 = vector.load %arg1[%c0, %c0_0] : memref<8x16xf32, #tpu.memory_space<vmem>>, vector<8x16xf32>
    %c0_1 = arith.constant 0 : index
    %c0_2 = arith.constant 0 : index
    %1 = vector.load %arg2[%c0_1, %c0_2] : memref<16x128xf32, #tpu.memory_space<vmem>>, vector<16x128xf32>
    %cst = arith.constant dense<0.000000e+00> : vector<8x128xf32>
    %2 = tpu.matmul %0, %1, %cst {dimension_numbers = #tpu.dot_dimension_numbers<[1], [0], [0], [1], [0, 0, 1, 1], [], []>} : vector<8x16xf32>, vector<16x128xf32>, vector<8x128xf32> -> vector<8x128xf32>
    %c0_3 = arith.constant 0 : index
    %c0_4 = arith.constant 0 : index
    %3 = vector.load %arg3[%c0_3, %c0_4] : memref<1x128xf32, #tpu.memory_space<vmem>>, vector<1x128xf32>
    %4 = vector.broadcast %3 : vector<1x128xf32> to vector<8x128xf32>
    %5 = arith.addf %2, %4 : vector<8x128xf32>
    %cst_5 = arith.constant 0.000000e+00 : f32
    %6 = vector.broadcast %cst_5 : f32 to vector<8x128xf32>
    %7 = arith.maximumf %5, %6 : vector<8x128xf32>
    %c0_6 = arith.constant 0 : index
    %c0_7 = arith.constant 0 : index
    %8 = vector.load %arg4[%c0_6, %c0_7] : memref<128x128xf32, #tpu.memory_space<vmem>>, vector<128x128xf32>
    %cst_8 = arith.constant dense<0.000000e+00> : vector<8x128xf32>
    %9 = tpu.matmul %7, %8, %cst_8 {dimension_numbers = #tpu.dot_dimension_numbers<[1], [0], [0], [1], [0, 0, 1, 1], [], []>} : vector<8x128xf32>, vector<128x128xf32>, vector<8x128xf32> -> vector<8x128xf32>
    %c0_9 = arith.constant 0 : index
    %c0_10 = arith.constant 0 : index
    %10 = vector.load %arg5[%c0_9, %c0_10] : memref<1x128xf32, #tpu.memory_space<vmem>>, vector<1x128xf32>
    %11 = vector.broadcast %10 : vector<1x128xf32> to vector<8x128xf32>
    %12 = arith.addf %9, %11 : vector<8x128xf32>
    %c0_11 = arith.constant 0 : index
    %c0_12 = arith.constant 0 : index
    %13 = vector.load %arg6[%c0_11, %c0_12] : memref<8x128xf32, #tpu.memory_space<vmem>>, vector<8x128xf32>
    tpu.vector_store %arg6[%c0_11, %c0_12], %12 {strides = array<i32>} : memref<8x128xf32, #tpu.memory_space<vmem>>, vector<8x128xf32>,
    return
  }
  func.func @transform_0(%arg0: i32) -> (i32, i32) {
    %c0_i32 = arith.constant 0 : i32
    %c0_i32_0 = arith.constant 0 : i32
    return %arg0, %c0_i32 : i32, i32
  }
  func.func @transform_1(%arg0: i32) -> (i32, i32) {
    %c0_i32 = arith.constant 0 : i32
    %c0_i32_0 = arith.constant 0 : i32
    %c0_i32_1 = arith.constant 0 : i32
    return %c0_i32, %c0_i32_0 : i32, i32
  }
  func.func @transform_2(%arg0: i32) -> (i32, i32) {
    %c0_i32 = arith.constant 0 : i32
    %c0_i32_0 = arith.constant 0 : i32
    %c0_i32_1 = arith.constant 0 : i32
    return %c0_i32, %c0_i32_0 : i32, i32
  }
  func.func @transform_3(%arg0: i32) -> (i32, i32) {
    %c0_i32 = arith.constant 0 : i32
    %c0_i32_0 = arith.constant 0 : i32
    %c0_i32_1 = arith.constant 0 : i32
    return %c0_i32, %c0_i32_0 : i32, i32
  }
  func.func @transform_4(%arg0: i32) -> (i32, i32) {
    %c0_i32 = arith.constant 0 : i32
    %c0_i32_0 = arith.constant 0 : i32
    %c0_i32_1 = arith.constant 0 : i32
    return %c0_i32, %c0_i32_0 : i32, i32
  }
  func.func @transform_5(%arg0: i32) -> (i32, i32) {
    %c0_i32 = arith.constant 0 : i32
    %c0_i32_0 = arith.constant 0 : i32
    return %arg0, %c0_i32 : i32, i32
  }
}

</mosaic_0001>

<bundles_post_ra>
// kernel: mlp_actor_forward.1
= control target key start
LH: loop header
LB: loop body
LE: loop exit
PB: predicated region body
PF: predicated region fallthrough
CT: control target
= control target key end

     0   :  { %v298_v0 = vmov 0.0|0.0   ;;  %vm299_vm0 = vmmov 0   ;;  %v300_v3 = vmov 0.0   ;;  %vm30_vm1 = vcmask 130048   ;;  %s397_s1 = inlined_call_operand.vmem [shape: f32[16,128], index: 1, kind: input, shape index: {}]   ;;  %s398_s3 = inlined_call_operand.vmem [shape: f32[128,128], index: 3, kind: input, shape index: {}]   ;;  %s399_s0 = inlined_call_operand.vmem [shape: f32[8,16], index: 0, kind: input, shape index: {}]   ;;  %s400_s2 = inlined_call_operand.vmem [shape: f32[1,128], index: 2, kind: input, shape index: {}]   ;;  %s401_s4 = inlined_call_operand.vmem [shape: f32[1,128], index: 4, kind: input, shape index: {}]   ;;  %s402_s5 = inlined_call_operand.vmem [shape: f32[8,128], index: 5, kind: output, shape index: {}]  }
   0x1   :  { %268 = vmatprep.subr.bf16.mxu0 %v298_v0  ;;  %v21_v1 = vld [vmem:[%s397_s1] sm:$0xff]  ;;  %v22_v2 = vld [vmem:[%s397_s1 + $0x8] sm:$0xff]  ;;  %230 = vmatprep.mubr.msk.f32.mxu0 %vm299_vm0, %v300_v3  ;;  %v107_v7 = vld [vmem:[%s398_s3 + $0x10] sm:$0xff] }
   0x2   :  { %v269_v4 = vpack.c.bf16 %v22_v2, %v21_v1  ;;  %271 = vmatprep.subr.bf16.mxu1 %v298_v0  ;;  %v105_v5 = vld [vmem:[%s398_s3] sm:$0xff]  ;;  %v106_v6 = vld [vmem:[%s398_s3 + $0x8] sm:$0xff]  ;;  %265 = vmatprep.mubr.msk.f32.mxu1 %vm299_vm0, %v300_v3  ;;  %v108_v9 = vld [vmem:[%s398_s3 + $0x18] sm:$0xff] }
   0x3   :  { %v272_v8 = vpack.c.bf16 %v106_v6, %v105_v5  ;;  %v20_v10 = vld [vmem:[%s399_s0] sm:$0xff]  ;;  %v275_v11 = vpack.c.bf16 %v108_v9, %v107_v7  ;;  %v110_v13 = vld [vmem:[%s398_s3 + $0x28] sm:$0xff]  ;;  %v111_v15 = vld [vmem:[%s398_s3 + $0x30] sm:$0xff] }
   0x4   :  { %270 = vmatpush3.bf16.msra.mxu0 %v269_v4  ;;  %v109_v12 = vld [vmem:[%s398_s3 + $0x20] sm:$0xff]  ;;  %v112_v16 = vld [vmem:[%s398_s3 + $0x38] sm:$0xff]  ;;  %v114_v19 = vld [vmem:[%s398_s3 + $0x48] sm:$0xff] }
   0x5   :  { %273 = vmatpush3.bf16.msra.mxu1 %v272_v8  ;;  %v278_v14 = vpack.c.bf16 %v110_v13, %v109_v12  ;;  %v281_v17 = vpack.c.bf16 %v112_v16, %v111_v15  ;;  %v113_v18 = vld [vmem:[%s398_s3 + $0x40] sm:$0xff]  ;;  %v115_v21 = vld [vmem:[%s398_s3 + $0x50] sm:$0xff]  ;;  %v116_v22 = vld [vmem:[%s398_s3 + $0x58] sm:$0xff] }
   0x6   :  { %274 = vmatprep.subr.bf16.mxu1 %v298_v0  ;;  %v284_v20 = vpack.c.bf16 %v114_v19, %v113_v18  ;;  %v287_v23 = vpack.c.bf16 %v116_v22, %v115_v21  ;;  %v117_v24 = vld [vmem:[%s398_s3 + $0x60] sm:$0xff]  ;;  %v118_v25 = vld [vmem:[%s398_s3 + $0x68] sm:$0xff]  ;;  %v119_v27 = vld [vmem:[%s398_s3 + $0x70] sm:$0xff] }
   0x7   :  { %231 = vmatmul.mubr.msk.f32.vlgmr.msra.gmra.mrb[0].mxu0 %vm30_vm1, %v20_v10  ;;  %v290_v26 = vpack.c.bf16 %v118_v25, %v117_v24  ;;  %v120_v28 = vld [vmem:[%s398_s3 + $0x78] sm:$0xff]  ;;  %v203_v30 = vld [vmem:[%s400_s2] ss:$0 sm:$0xff] }
   0x8   :  { %v293_v29 = vpack.c.bf16 %v120_v28, %v119_v27  ;;  %v205_v35 = vld [vmem:[%s401_s4] ss:$0 sm:$0xff] }
   0x9   :  { %276 = vmatpush3.bf16.msra.mxu1 %v275_v11 }
   0xa   :  { %277 = vmatprep.subr.bf16.mxu1 %v298_v0 }
   0xd   :  { %279 = vmatpush3.bf16.msra.mxu1 %v278_v14 }
   0xe   :  { %280 = vmatprep.subr.bf16.mxu1 %v298_v0 }
  0x11   :  { %282 = vmatpush3.bf16.msra.mxu1 %v281_v17 }
  0x12   :  { %283 = vmatprep.subr.bf16.mxu1 %v298_v0 }
  0x15   :  { %285 = vmatpush3.bf16.msra.mxu1 %v284_v20 }
  0x16   :  { %286 = vmatprep.subr.bf16.mxu1 %v298_v0 }
  0x19   :  { %288 = vmatpush3.bf16.msra.mxu1 %v287_v23 }
  0x1a   :  { %289 = vmatprep.subr.bf16.mxu1 %v298_v0 }
  0x1d   :  { %291 = vmatpush3.bf16.msra.mxu1 %v290_v26 }
  0x1e   :  { %292 = vmatprep.subr.bf16.mxu1 %v298_v0 }
  0x21   :  { %294 = vmatpush3.bf16.msra.mxu1 %v293_v29 }
  0xda   :  { %v100_v31 = vpop.f32.mrb[0].mxu0 }
  0xdb   :  { %v101_v32 = vadd.f32 %v203_v30, %v100_v31  ;;  %v232_v33 = vpop.f32.mrb[1].mxu0 }
  0xdd   :  { %v104_v34 = vmax.f32 %v101_v32, 0.0 }
  0xdf   :  { %266 = vmatmul.mubr.f32.vlgmr.msra.gmra.mrb[0].mxu1 %v104_v34 }
 0x1b2   :  { %v194_v36 = vpop.f32.mrb[0].mxu1 }
 0x1b3   :  { %v195_v37 = vadd.f32 %v205_v35, %v194_v36  ;;  %v267_v38 = vpop.f32.mrb[1].mxu1 }
 0x1b5   :  { %198 = vst [vmem:[%s402_s5] sm:$0xff] %v195_v37 }

</bundles_post_ra>
